<compile_context>
chip_gen: v6e
topology: v6e:2x2x1
jax: 0.10.0
libtpu: 0.0.40
codegen_flags: <defaults>
</compile_context>

<pallas_src>
import jax
import jax.numpy as jnp
from jax.experimental import pallas as pl
from jax.experimental.pallas import tpu as pltpu


def _round_up(v, m):
    return (v + m - 1) // m * m


def _netvlad_kernel(x_ref, w_ref, b_ref, c_ref, out_ref):
    # x_ref: (B, S, D)  w_ref: (K, D)  b_ref: (1, K)  c_ref: (K, D)  out_ref: (B, K, D)
    eps = 1e-12
    B, S, D = x_ref.shape
    K = w_ref.shape[0]
    f32 = jnp.float32

    x = x_ref[...].astype(f32)                                        # (B, S, D)

    # F.normalize(x, p=2, dim=1): per-descriptor L2 norm over channels.
    # x * rsqrt(max(ss, eps^2)) == x / max(sqrt(ss), eps); rsqrt runs on the EUP slot.
    x = x * jax.lax.rsqrt(
        jnp.maximum(jnp.sum(x * x, axis=2, keepdims=True), eps * eps))

    # 1x1 Conv2d(D -> K) == a single (B*S, D) @ (D, K) matmul + bias (M = B*S).
    logits = jnp.einsum("md,kd->mk", x.reshape(B * S, D), w_ref[...],
                        preferred_element_type=f32) + b_ref[...]      # (B*S, K)

    # softmax over clusters (per spatial location); EUP reciprocal for the denom.
    e = jnp.exp(logits - jnp.max(logits, axis=1, keepdims=True))
    a = (e * pl.reciprocal(jnp.sum(e, axis=1, keepdims=True), approx=True)
         ).reshape(B, S, K)                                           # (B, S, K)

    # vlad[b,k,d] = sum_s a[b,s,k] * (x[b,s,d] - c[k,d])
    #            = sum_s a[b,s,k] * x[b,s,d]  -  a_sum[b,k] * c[k,d]
    # Fold the -a_sum*c correction into the SAME matmul by extending the reduction
    # axis with K virtual rows: coefficients -a_sum[b,k]*I[j,k] paired with c[j,:].
    a_sum = jnp.sum(a, axis=1, keepdims=True)                         # (B, 1, K)
    eye = (jax.lax.broadcasted_iota(jnp.int32, (K, K), 0) ==
           jax.lax.broadcasted_iota(jnp.int32, (K, K), 1)).astype(f32)
    a_ext = jnp.concatenate([a, -(a_sum * eye[None])], axis=1)        # (B, S+K, K)
    x_ext = jnp.concatenate(
        [x, jnp.broadcast_to(c_ref[...], (B, K, D))], axis=1)         # (B, S+K, D)
    vlad = jnp.einsum("btk,btd->bkd", a_ext, x_ext,
                      preferred_element_type=f32)                     # (B, K, D)

    # intra-normalization (per cluster row)
    vlad = vlad * jax.lax.rsqrt(
        jnp.maximum(jnp.sum(vlad * vlad, axis=2, keepdims=True), eps * eps))

    # final L2 normalization of the flattened (K*D) descriptor
    row_sq = jnp.sum(vlad * vlad, axis=2, keepdims=True)              # (B, K, 1)
    tot_sq = jnp.sum(row_sq, axis=1, keepdims=True)                   # (B, 1, 1)
    vlad = vlad * jax.lax.rsqrt(jnp.maximum(tot_sq, eps * eps))

    out_ref[...] = vlad


def netvlad_pool(x_nsd, conv_w, conv_b, centroids, block_batch=16):
    """x_nsd: (N, S, D) float32 -> (N, K*D) float32 (each row L2-normalized)."""
    N, S, D = x_nsd.shape
    K = centroids.shape[0]
    # Batch B samples per grid step: amortizes per-step pipeline overhead and makes
    # the logits matmul M-dim B*S (e.g. 16*16 = 256, matching the v6e/v7x MXU).
    B = min(block_batch, N)
    N_pad = _round_up(N, B)
    if N_pad != N:
        # Zero padding is safe: padded rows produce finite garbage and are sliced off.
        x_nsd = jnp.pad(x_nsd, ((0, N_pad - N), (0, 0), (0, 0)))

    # TODO(synk): for production-size S (H*W in the thousands) add an S-axis grid with
    # VMEM accumulators (pl.when init/finalize) so blocks fit v7x's 64 MiB VMEM.
    out = pl.pallas_call(
        _netvlad_kernel,
        out_shape=jax.ShapeDtypeStruct((N_pad, K, D), jnp.float32),
        grid=(N_pad // B,),
        in_specs=[
            pl.BlockSpec((B, S, D), lambda n: (n, 0, 0)),
            pl.BlockSpec((K, D), lambda n: (0, 0)),
            pl.BlockSpec((1, K), lambda n: (0, 0)),
            pl.BlockSpec((K, D), lambda n: (0, 0)),
        ],
        out_specs=pl.BlockSpec((B, K, D), lambda n: (n, 0, 0)),
        compiler_params=pltpu.CompilerParams(
            dimension_semantics=("parallel",)),
    )(x_nsd, conv_w, conv_b.reshape(1, K), centroids)

    # (N, K, D) -> (N, K*D): row-major flatten == torch's vlad.view(N, -1); this is a
    # zero-cost layout-preserving reshape in XLA.
    return out[:N].reshape(N, K * D)


def _to_nsd(feat):
    # NCHW -> (N, S=H*W, D=C) so channels sit on the TPU lane axis.
    N, C, H, W = feat.shape
    return jnp.transpose(feat.reshape(N, C, H * W), (0, 2, 1)).astype(jnp.float32)


def vlad_mlp_forward(params, data_dict):
    """Mirror of VLAD_MLP.forward / GF_VLAD.forward (eval mode)."""
    feats_list = data_dict["feats"]
    # TODO(synk): training-mode Dropout(cfg.drop_out) omitted; eval semantics (identity).
    shapes = {tuple(jnp.asarray(f).shape[1:]) for f in feats_list}
    if len(shapes) == 1:
        # All maps share (C, H, W): pool them in ONE pallas_call (order preserved,
        # identical to torch.cat(gf_list, dim=0)).
        feat = jnp.concatenate([jnp.asarray(f) for f in feats_list], axis=0)
        gf = netvlad_pool(_to_nsd(feat), params["conv_w"], params["conv_b"],
                          params["centroids"])
    else:
        gf = jnp.concatenate(
            [netvlad_pool(_to_nsd(jnp.asarray(f)), params["conv_w"],
                          params["conv_b"], params["centroids"])
             for f in feats_list], axis=0)
    # GF_VLAD(normalize=True): each descriptor is already L2-normalized inside the
    # kernel, so the wrapper-level feats/||feats|| pass is a no-op and is elided
    # (saves one HBM round trip).
    gfs = [gf]
    if "gt_overlap" in data_dict:
        return {"vlad_gf": gfs, "gt_overlap": data_dict["gt_overlap"]}
    return {"vlad_gf": gfs}


def _netvlad_reference(x_nsd, conv_w, conv_b, centroids):
    """Pure-JAX reference with exact F.normalize / softmax semantics."""
    eps = 1e-12
    x = x_nsd / jnp.maximum(jnp.linalg.norm(x_nsd, axis=2, keepdims=True), eps)
    logits = jnp.einsum("nsd,kd->nsk", x, conv_w) + conv_b
    a = jax.nn.softmax(logits, axis=2)
    agg = jnp.einsum("nsk,nsd->nkd", a, x)
    vlad = agg - jnp.sum(a, axis=1)[:, :, None] * centroids[None]
    vlad = vlad / jnp.maximum(jnp.linalg.norm(vlad, axis=2, keepdims=True), eps)
    flat = vlad.reshape(x.shape[0], -1)
    flat = flat / jnp.maximum(jnp.linalg.norm(flat, axis=1, keepdims=True), eps)
    return flat


if __name__ == "__main__":
    # cfg.vlad_cluster = K, cfg.vlad_dim = D, cfg.drop_out irrelevant at eval.
    K, D = 8, 32
    key = jax.random.PRNGKey(0)
    k1, k2, k3, k4, k5 = jax.random.split(key, 5)

    params = {
        # Conv2d(D, K, kernel_size=1) weight (K, D, 1, 1) squeezed to (K, D)
        "conv_w": 0.1 * jax.random.normal(k1, (K, D), jnp.float32),
        "conv_b": 0.1 * jax.random.normal(k2, (K,), jnp.float32),
        # NetVLAD centroids parameter (K, D), torch.rand-style init
        "centroids": jax.random.uniform(k3, (K, D), jnp.float32),
    }

    # data_dict['feats']: list of NCHW feature maps
    data_dict = {
        "feats": [
            jax.random.normal(k4, (2, D, 4, 4), jnp.float32),
            jax.random.normal(k5, (2, D, 4, 4), jnp.float32),
        ]
    }

    out = vlad_mlp_forward(params, data_dict)
    gf = jax.block_until_ready(out["vlad_gf"][0])
    assert gf.shape == (4, K * D), gf.shape

    x_all = jnp.concatenate([_to_nsd(f) for f in data_dict["feats"]], axis=0)
    ref = _netvlad_reference(x_all, params["conv_w"], params["conv_b"],
                             params["centroids"])
    err = float(jnp.max(jnp.abs(gf - ref)))
    assert err < 2e-2, f"max abs err vs reference: {err}"
    print("KERNEL_OK")
</pallas_src>

<mosaic_0001>
module attributes {stable_mosaic.version = 11 : i64} {
  func.func @_netvlad_kernel(%arg0: i32, %arg1: memref<4x16x32xf32, #tpu.memory_space<vmem>>, %arg2: memref<8x32xf32, #tpu.memory_space<vmem>>, %arg3: memref<1x8xf32, #tpu.memory_space<vmem>>, %arg4: memref<8x32xf32, #tpu.memory_space<vmem>>, %arg5: memref<4x8x32xf32, #tpu.memory_space<vmem>>) attributes {dimension_semantics = [#tpu.dimension_semantics<parallel>], iteration_bounds = array<i64: 1>, scalar_prefetch = 0 : i64, scratch_operands = 0 : i64, tpu.core_type = #tpu.core_type<tc>, window_params = [{transform_indices = @transform_0, window_bounds = array<i64: 4, 16, 32>}, {pipeline_mode = #tpu.pipeline_mode<synchronous>, transform_indices = @transform_1, window_bounds = array<i64: 8, 32>}, {pipeline_mode = #tpu.pipeline_mode<synchronous>, transform_indices = @transform_2, window_bounds = array<i64: 1, 8>}, {pipeline_mode = #tpu.pipeline_mode<synchronous>, transform_indices = @transform_3, window_bounds = array<i64: 8, 32>}, {transform_indices = @transform_4, window_bounds = array<i64: 4, 8, 32>}]} {
    %c0 = arith.constant 0 : index
    %c0_0 = arith.constant 0 : index
    %c0_1 = arith.constant 0 : index
    %0 = vector.load %arg1[%c0, %c0_0, %c0_1] : memref<4x16x32xf32, #tpu.memory_space<vmem>>, vector<4x16x32xf32>
    %1 = arith.mulf %0, %0 : vector<4x16x32xf32>
    %cst = arith.constant dense<0.000000e+00> : vector<4x16xf32>
    %2 = vector.multi_reduction <add>, %1, %cst [2] : vector<4x16x32xf32> to vector<4x16xf32>
    %3 = vector.shape_cast %2 : vector<4x16xf32> to vector<4x16x1xf32>
    %cst_2 = arith.constant 1.000000e-24 : f32
    %4 = vector.broadcast %cst_2 : f32 to vector<4x16x1xf32>
    %5 = arith.maximumf %3, %4 : vector<4x16x1xf32>
    %6 = math.rsqrt %5 : vector<4x16x1xf32>
    %7 = vector.broadcast %6 : vector<4x16x1xf32> to vector<4x16x32xf32>
    %8 = arith.mulf %0, %7 : vector<4x16x32xf32>
    %9 = vector.shape_cast %8 : vector<4x16x32xf32> to vector<64x32xf32>
    %c0_3 = arith.constant 0 : index
    %c0_4 = arith.constant 0 : index
    %10 = vector.load %arg2[%c0_3, %c0_4] : memref<8x32xf32, #tpu.memory_space<vmem>>, vector<8x32xf32>
    "tpu.trace_start"() <{level = 10 : i32, message = "md,kd->mk"}> : () -> ()
    %cst_5 = arith.constant dense<0.000000e+00> : vector<64x8xf32>
    %11 = tpu.matmul %9, %10, %cst_5 {dimension_numbers = #tpu.dot_dimension_numbers<[1], [1], [0], [0], [0, 0, 1, 0], [], []>} : vector<64x32xf32>, vector<8x32xf32>, vector<64x8xf32> -> vector<64x8xf32>
    "tpu.trace_stop"() : () -> ()
    %c0_6 = arith.constant 0 : index
    %c0_7 = arith.constant 0 : index
    %12 = vector.load %arg3[%c0_6, %c0_7] : memref<1x8xf32, #tpu.memory_space<vmem>>, vector<1x8xf32>
    %13 = vector.broadcast %12 : vector<1x8xf32> to vector<64x8xf32>
    %14 = arith.addf %11, %13 : vector<64x8xf32>
    %cst_8 = arith.constant dense<0xFF800000> : vector<64xf32>
    %15 = vector.multi_reduction <maximumf>, %14, %cst_8 [1] : vector<64x8xf32> to vector<64xf32>
    %16 = vector.shape_cast %15 : vector<64xf32> to vector<64x1xf32>
    %17 = vector.broadcast %16 : vector<64x1xf32> to vector<64x8xf32>
    %18 = arith.subf %14, %17 : vector<64x8xf32>
    %19 = math.exp %18 : vector<64x8xf32>
    %cst_9 = arith.constant dense<0.000000e+00> : vector<64xf32>
    %20 = vector.multi_reduction <add>, %19, %cst_9 [1] : vector<64x8xf32> to vector<64xf32>
    %21 = vector.shape_cast %20 : vector<64xf32> to vector<64x1xf32>
    %22 = tpu.reciprocal %21 {approx = true} : vector<64x1xf32> -> vector<64x1xf32>
    %23 = vector.broadcast %22 : vector<64x1xf32> to vector<64x8xf32>
    %24 = arith.mulf %19, %23 : vector<64x8xf32>
    %25 = vector.shape_cast %24 : vector<64x8xf32> to vector<4x16x8xf32>
    %cst_10 = arith.constant dense<0.000000e+00> : vector<4x8xf32>
    %26 = vector.multi_reduction <add>, %25, %cst_10 [1] : vector<4x16x8xf32> to vector<4x8xf32>
    %27 = vector.shape_cast %26 : vector<4x8xf32> to vector<4x1x8xf32>
    %28 = tpu.iota {dimensions = array<i32: 0>} : vector<8x8xi32>
    %29 = tpu.iota {dimensions = array<i32: 1>} : vector<8x8xi32>
    %30 = arith.cmpi eq, %28, %29 : vector<8x8xi32>
    %31 = arith.extui %30 : vector<8x8xi1> to vector<8x8xi32>
    %32 = arith.sitofp %31 : vector<8x8xi32> to vector<8x8xf32>
    %33 = vector.shape_cast %32 : vector<8x8xf32> to vector<1x8x8xf32>
    %34 = vector.broadcast %27 : vector<4x1x8xf32> to vector<4x8x8xf32>
    %35 = vector.broadcast %33 : vector<1x8x8xf32> to vector<4x8x8xf32>
    %36 = arith.mulf %34, %35 : vector<4x8x8xf32>
    %cst_11 = arith.constant 0.000000e+00 : f32
    %37 = vector.broadcast %cst_11 : f32 to vector<4x8x8xf32>
    %38 = arith.subf %37, %36 : vector<4x8x8xf32>
    %39 = tpu.concatenate %25, %38 in 1 : vector<4x16x8xf32>, vector<4x8x8xf32> -> vector<4x24x8xf32>
    %c0_12 = arith.constant 0 : index
    %c0_13 = arith.constant 0 : index
    %40 = vector.load %arg4[%c0_12, %c0_13] : memref<8x32xf32, #tpu.memory_space<vmem>>, vector<8x32xf32>
    %41 = vector.shape_cast %40 : vector<8x32xf32> to vector<1x8x32xf32>
    %42 = vector.broadcast %41 : vector<1x8x32xf32> to vector<4x8x32xf32>
    %43 = tpu.concatenate %8, %42 in 1 : vector<4x16x32xf32>, vector<4x8x32xf32> -> vector<4x24x32xf32>
    "tpu.trace_start"() <{level = 10 : i32, message = "btk,btd->bkd"}> : () -> ()
    %cst_14 = arith.constant dense<0.000000e+00> : vector<4x8x32xf32>
    %44 = tpu.matmul %39, %43, %cst_14 {dimension_numbers = #tpu.dot_dimension_numbers<[1], [1], [2], [2], [0, 0, 0, 2, 1, 2], [0], [0]>} : vector<4x24x8xf32>, vector<4x24x32xf32>, vector<4x8x32xf32> -> vector<4x8x32xf32>
    "tpu.trace_stop"() : () -> ()
    %45 = arith.mulf %44, %44 : vector<4x8x32xf32>
    %cst_15 = arith.constant dense<0.000000e+00> : vector<4x8xf32>
    %46 = vector.multi_reduction <add>, %45, %cst_15 [2] : vector<4x8x32xf32> to vector<4x8xf32>
    %47 = vector.shape_cast %46 : vector<4x8xf32> to vector<4x8x1xf32>
    %cst_16 = arith.constant 1.000000e-24 : f32
    %48 = vector.broadcast %cst_16 : f32 to vector<4x8x1xf32>
    %49 = arith.maximumf %47, %48 : vector<4x8x1xf32>
    %50 = math.rsqrt %49 : vector<4x8x1xf32>
    %51 = vector.broadcast %50 : vector<4x8x1xf32> to vector<4x8x32xf32>
    %52 = arith.mulf %44, %51 : vector<4x8x32xf32>
    %53 = arith.mulf %52, %52 : vector<4x8x32xf32>
    %cst_17 = arith.constant dense<0.000000e+00> : vector<4x8xf32>
    %54 = vector.multi_reduction <add>, %53, %cst_17 [2] : vector<4x8x32xf32> to vector<4x8xf32>
    %55 = vector.shape_cast %54 : vector<4x8xf32> to vector<4x8x1xf32>
    %cst_18 = arith.constant dense<0.000000e+00> : vector<4x1xf32>
    %56 = vector.multi_reduction <add>, %55, %cst_18 [1] : vector<4x8x1xf32> to vector<4x1xf32>
    %57 = vector.shape_cast %56 : vector<4x1xf32> to vector<4x1x1xf32>
    %cst_19 = arith.constant 1.000000e-24 : f32
    %58 = vector.broadcast %cst_19 : f32 to vector<4x1x1xf32>
    %59 = arith.maximumf %57, %58 : vector<4x1x1xf32>
    %60 = math.rsqrt %59 : vector<4x1x1xf32>
    %61 = vector.broadcast %60 : vector<4x1x1xf32> to vector<4x8x32xf32>
    %62 = arith.mulf %52, %61 : vector<4x8x32xf32>
    %c0_20 = arith.constant 0 : index
    %c0_21 = arith.constant 0 : index
    %c0_22 = arith.constant 0 : index
    %63 = vector.load %arg5[%c0_20, %c0_21, %c0_22] : memref<4x8x32xf32, #tpu.memory_space<vmem>>, vector<4x8x32xf32>
    tpu.vector_store %arg5[%c0_20, %c0_21, %c0_22], %62 {strides = array<i32>} : memref<4x8x32xf32, #tpu.memory_space<vmem>>, vector<4x8x32xf32>,
    return
  }
  func.func @transform_0(%arg0: i32) -> (i32, i32, i32) {
    %c0_i32 = arith.constant 0 : i32
    %c0_i32_0 = arith.constant 0 : i32
    %c0_i32_1 = arith.constant 0 : i32
    return %arg0, %c0_i32, %c0_i32_0 : i32, i32, i32
  }
  func.func @transform_1(%arg0: i32) -> (i32, i32) {
    %c0_i32 = arith.constant 0 : i32
    %c0_i32_0 = arith.constant 0 : i32
    %c0_i32_1 = arith.constant 0 : i32
    return %c0_i32, %c0_i32_0 : i32, i32
  }
  func.func @transform_2(%arg0: i32) -> (i32, i32) {
    %c0_i32 = arith.constant 0 : i32
    %c0_i32_0 = arith.constant 0 : i32
    %c0_i32_1 = arith.constant 0 : i32
    return %c0_i32, %c0_i32_0 : i32, i32
  }
  func.func @transform_3(%arg0: i32) -> (i32, i32) {
    %c0_i32 = arith.constant 0 : i32
    %c0_i32_0 = arith.constant 0 : i32
    %c0_i32_1 = arith.constant 0 : i32
    return %c0_i32, %c0_i32_0 : i32, i32
  }
  func.func @transform_4(%arg0: i32) -> (i32, i32, i32) {
    %c0_i32 = arith.constant 0 : i32
    %c0_i32_0 = arith.constant 0 : i32
    %c0_i32_1 = arith.constant 0 : i32
    return %arg0, %c0_i32, %c0_i32_0 : i32, i32, i32
  }
}

</mosaic_0001>

<bundles_post_ra>
// kernel: tpu_custom_call.1
= control target key start
LH: loop header
LB: loop body
LE: loop exit
PB: predicated region body
PF: predicated region fallthrough
CT: control target
= control target key end

     0   :  { %9 = vsyncpa [#allocation3], 0  ;;  %s1367_s0 = inlined_call_operand.hbm [shape: f32[4,16,32], index: 0, kind: input, shape index: {}]   ;;  %s1368_s1 = inlined_call_operand.hbm [shape: f32[8,32], index: 1, kind: input, shape index: {}]   ;;  %s1369_s2 = inlined_call_operand.vmem [shape: f32[1,8], index: 2, kind: input, shape index: {}]   ;;  %s1370_s3 = inlined_call_operand.hbm [shape: f32[8,32], index: 3, kind: input, shape index: {}]   ;;  %s1371_s4 = inlined_call_operand.hbm [shape: f32[4,8,32], index: 4, kind: output, shape index: {}]  }
   0x1   :  { %10 = vsyncpa [#allocation6], 0 }
   0x2   :  { %11 = vsyncpa [#allocation4], 0  ;;  %s1172_s15 = smov [#allocation5]   ;;  %s1173_s17 = smov [#allocation2]  }
   0x3   :  { %s30_s16 = sshll.u32 %s1172_s15, 4  ;;  %s17_s18 = sshll.u32 %s1173_s17, 4  ;;  %s31_s16 = int_to_ptr.vmem [resolvable:$true] %s30_s16  ;;  %s18_s18 = int_to_ptr.vmem [resolvable:$true] %s17_s18 }
   0x4   :  { %s1094_s19 = scalar_lea.vmem %s31_s16, 128  ;;  %p1099_p1 = scmp.lt.s32.totalorder %s31_s16, %s31_s16 }
   0x5   :  { %p1095_p0 = scmp.ne.s32.totalorder %s31_s16, %s1094_s19  ;;  %p1100_p2 = scmp.lt.s32.totalorder %s1094_s19, %s1094_s19 }
   0x7   :  { %p1101_p3 = por %p1100_p2, %p1099_p1 }
   0x9   :  { %p1102_p4 = pnand %p1101_p3, %p1095_p0 }
   0xb   :  { %1105 = shalt.err (!%p1102_p4)
}
   0xc   :  { %33 = dma.hbm_to_vmem [thread:$0]  %s1368_s1, 128, %s31_s16, [#allocation6]  }
   0xd   :  { %s1114_s22 = scalar_lea.vmem %s18_s18, 1024  ;;  %p1119_p6 = scmp.lt.s32.totalorder %s18_s18, %s18_s18 }
   0xe   :  { %p1115_p5 = scmp.ne.s32.totalorder %s18_s18, %s1114_s22  ;;  %p1120_p7 = scmp.lt.s32.totalorder %s1114_s22, %s1114_s22 }
  0x10   :  { %p1121_p8 = por %p1120_p7, %p1119_p6 }
  0x12   :  { %p1122_p9 = pnand %p1121_p8, %p1115_p5 }
  0x14   :  { %1125 = shalt.err (!%p1122_p9)
}
  0x15   :  { %s1174_s23 = smov 128   ;;  %s1175_s24 = smov 8  }
  0x16   :  { %23 = dma.hbm_to_vmem [thread:$0]  %s1367_s0, 1024, %s18_s18, [#allocation3], %s1174_s23, %s1174_s23, %s1175_s24  }
  0x17   :  { %s1176_s27 = smov [#allocation7]  }
  0x18   :  { %s42_s28 = sshll.u32 %s1176_s27, 4  ;;  %s43_s28 = int_to_ptr.vmem [resolvable:$true] %s42_s28 }
  0x19   :  { %s1134_s1 = scalar_lea.vmem %s43_s28, 128  ;;  %p1139_p11 = scmp.lt.s32.totalorder %s43_s28, %s43_s28 }
  0x1a   :  { %p1135_p10 = scmp.ne.s32.totalorder %s43_s28, %s1134_s1  ;;  %p1140_p12 = scmp.lt.s32.totalorder %s1134_s1, %s1134_s1 }
  0x1c   :  { %p1141_p13 = por %p1140_p12, %p1139_p11 }
  0x1e   :  { %p1142_p0 = pnand %p1141_p13, %p1135_p10 }
  0x20   :  { %1145 = shalt.err (!%p1142_p0)
}
  0x21   :  { %45 = dma.hbm_to_vmem [thread:$0]  %s1370_s3, 128, %s43_s28, [#allocation6]  }
  0x22   :  { %1166 = dma.done.wait [#allocation3], 1024  }
  0x23   :  { %1167 = vsyncadd [#allocation3], 4294966272 }
  0x24   :  { %1168 = dma.done.wait [#allocation6], 256  }
  0x25   :  { %1169 = vsyncadd [#allocation6], 4294967040  ;;  %v1217_v0 = vld [vmem:[#allocation2] sm:$0xff]  ;;  %vm71_vm0 = vcmask 261120   ;;  %v1219_v1 = vld [vmem:[#allocation2 + $0x10] sm:$0xff]  ;;  %v1177_v26 = vmov 0.0  }
  0x26   :  { %v1221_v2 = vld [vmem:[#allocation2 + $0x8] sm:$0xff]  ;;  %v63_v3 = vmul.f32 %v1217_v0, %v1217_v0  ;;  %v65_v4 = vmul.f32 %v1219_v1, %v1219_v1  ;;  %v1229_v6 = vld [vmem:[#allocation2 + $0x18] sm:$0xff]  ;;  %v1233_v8 = vld [vmem:[#allocation2 + $0x20] sm:$0xff]  ;;  %978 = vmatprep.subr.mxu1 %v1177_v26  ;;  %vm260_vm1 = vcmask 64512   ;;  %vm1178_vm2 = vmmov 0  }
  0x27   :  { %v64_v5 = vmul.f32 %v1221_v2, %v1221_v2  ;;  %v66_v7 = vmul.f32 %v1229_v6, %v1229_v6  ;;  %v1235_v9 = vld [vmem:[#allocation2 + $0x28] sm:$0xff]  ;;  %v67_v14 = vmul.f32 %v1233_v8, %v1233_v8  ;;  %v1245_v16 = vld [vmem:[#allocation2 + $0x30] sm:$0xff]  ;;  %v1247_v17 = vld [vmem:[#allocation2 + $0x38] sm:$0xff]  ;;  %984 = vmatprep.mubr.msk.f32.mxu1 %vm1178_vm2, %v1177_v26  ;;  %vm433_vm4 = vcmask 195584  }
  0x28   :  { %v72_v10 = vsel %vm71_vm0, %v63_v3, 0.0  ;;  %v78_v11 = vsel %vm71_vm0, %v65_v4, 0.0  ;;  %v68_v15 = vmul.f32 %v1235_v9, %v1235_v9  ;;  %v69_v20 = vmul.f32 %v1245_v16, %v1245_v16  ;;  %v120_v24 = vld [vmem:[#allocation5] sm:$0xff]  ;;  %v1259_v25 = vld [vmem:[#allocation7] sm:$0xff] }
  0x29   :  { %73 = vadd.xlane.f32.xlu0 %v72_v10  ;;  %79 = vadd.xlane.f32.xlu1 %v78_v11  ;;  %v75_v12 = vsel %vm71_vm0, %v64_v5, 0.0  ;;  %v81_v13 = vsel %vm71_vm0, %v66_v7, 0.0  ;;  %v84_v18 = vsel %vm71_vm0, %v67_v14, 0.0  ;;  %v70_v21 = vmul.f32 %v1247_v17, %v1247_v17  ;;  %v924_v59 = vld [vmem:[%s1369_s2] ss:$0 sm:$0xff]  ;;  %s1179_s2 = smov [#allocation8]  }
  0x2a   :  { %v87_v19 = vsel %vm71_vm0, %v68_v15, 0.0  ;;  %v90_v22 = vsel %vm71_vm0, %v69_v20, 0.0  ;;  %964 = vmatprep.subr.msk.mxu0 %vm71_vm0, %v120_v24  ;;  %979 = vmatpush3.msra.mxu1 %v1259_v25  ;;  %s911_s5 = sshll.u32 %s1179_s2, 4  ;;  %s912_s5 = int_to_ptr.vmem [resolvable:$true] %s911_s5 }
  0x2b   :  { %v93_v23 = vsel %vm71_vm0, %v70_v21, 0.0  ;;  %965 = vmatpush3.xpose.msk.msra.mxu0 %vm71_vm0, %v120_v24  ;;  %980 = vmatprep.subr.mxu1 %v1177_v26  ;;  %s1146_s6 = scalar_lea.vmem %s912_s5, 512  ;;  %p1151_p2 = scmp.lt.s32.totalorder %s912_s5, %s912_s5 }
  0x2c   :  { %1005 = vmatprep.subr.mxu0 %v1177_v26  ;;  %p1147_p1 = scmp.ne.s32.totalorder %s912_s5, %s1146_s6  ;;  %p1152_p3 = scmp.lt.s32.totalorder %s1146_s6, %s1146_s6 }
  0x2d   :  { %76 = vadd.xlane.f32.xlu0 %v75_v12  ;;  %82 = vadd.xlane.f32.xlu1 %v81_v13 }
  0x2e   :  { %p1153_p4 = por %p1152_p3, %p1151_p2 }
  0x30   :  { %p1154_p5 = pnand %p1153_p4, %p1147_p1 }
  0x31   :  { %85 = vadd.xlane.f32.xlu0 %v84_v18  ;;  %88 = vadd.xlane.f32.xlu1 %v87_v19 }
  0x35   :  { %91 = vadd.xlane.f32.xlu0 %v90_v22  ;;  %94 = vadd.xlane.f32.xlu1 %v93_v23 }
  0xb2   :  { %v74_v27 = vpop.xlane.xlu0 %73  ;;  %v80_v28 = vpop.xlane.xlu1 %79 }
  0xb3   :  { %v96_v29 = vmax.f32 %v74_v27, 1e-24  ;;  %v98_v30 = vmax.f32 %v80_v28, 1e-24 }
  0xb5   :  { %1022 = vrsqrt.f32 %v96_v29 }
  0xb6   :  { %1024 = vrsqrt.f32 %v98_v30  ;;  %v77_v31 = vpop.xlane.xlu0 %76  ;;  %v83_v32 = vpop.xlane.xlu1 %82 }
  0xb7   :  { %v97_v33 = vmax.f32 %v77_v31, 1e-24  ;;  %v99_v34 = vmax.f32 %v83_v32, 1e-24 }
  0xb9   :  { %1026 = vrsqrt.f32 %v97_v33 }
  0xba   :  { %1028 = vrsqrt.f32 %v99_v34  ;;  %v86_v35 = vpop.xlane.xlu0 %85  ;;  %v89_v36 = vpop.xlane.xlu1 %88 }
  0xbb   :  { %v100_v37 = vmax.f32 %v86_v35, 1e-24  ;;  %v101_v38 = vmax.f32 %v89_v36, 1e-24 }
  0xbd   :  { %1030 = vrsqrt.f32 %v100_v37 }
  0xbe   :  { %1032 = vrsqrt.f32 %v101_v38  ;;  %v92_v39 = vpop.xlane.xlu0 %91  ;;  %v95_v40 = vpop.xlane.xlu1 %94 }
  0xbf   :  { %v102_v41 = vmax.f32 %v92_v39, 1e-24  ;;  %v103_v42 = vmax.f32 %v95_v40, 1e-24 }
  0xc1   :  { %1034 = vrsqrt.f32 %v102_v41 }
  0xc2   :  { %v1023_v43 = vpop.eup %1022  ;;  %1036 = vrsqrt.f32 %v103_v42 }
  0xc3   :  { %v1025_v44 = vpop.eup %1024  ;;  %v112_v45 = vmul.f32 %v1023_v43, %v1217_v0 }
  0xc4   :  { %v1268_v47 = vmul.f32 %v1025_v44, %v1219_v1 }
  0xc5   :  { %966 = vmatprep.mubr.msk.f32.mxu0 %vm71_vm0, %v112_v45 }
  0xc6   :  { %v1027_v46 = vpop.eup %1026 }
  0xc7   :  { %v1029_v48 = vpop.eup %1028  ;;  %v113_v49 = vmul.f32 %v1027_v46, %v1221_v2 }
  0xc8   :  { %v1273_v50 = vmul.f32 %v1029_v48, %v1229_v6 }
  0xc9   :  { %967 = vmatmul.mubr.msk.f32.vlgmr.msra.gmra.mxu0 %vm71_vm0, %v113_v49  ;;  %981 = vmatpush3.msra.mxu1 %v113_v49 }
  0xca   :  { %v1031_v51 = vpop.eup %1030  ;;  %969 = vmatprep.mubr.msk.f32.mxu0 %vm71_vm0, %v1268_v47  ;;  %982 = vmatprep.subr.mxu1 %v1177_v26 }
  0xcb   :  { %v1033_v52 = vpop.eup %1032  ;;  %983 = vmatpush3.msra.mxu1 %v112_v45  ;;  %v1279_v53 = vmul.f32 %v1031_v51, %v1233_v8  ;;  %1006 = vmatpush3.msra.mxu0 %v1259_v25 }
  0xcc   :  { %1007 = vmatprep.subr.mxu0 %v1177_v26  ;;  %987 = vmatprep.subr.mxu1 %v1177_v26  ;;  %v1287_v54 = vmul.f32 %v1033_v52, %v1235_v9 }
  0xcd   :  { %970 = vmatmul.mubr.msk.f32.gmra.mxu0 %vm71_vm0, %v1273_v50 }
  0xce   :  { %v1035_v55 = vpop.eup %1034  ;;  %972 = vmatprep.mubr.msk.f32.mxu0 %vm71_vm0, %v1279_v53 }
  0xcf   :  { %v1037_v56 = vpop.eup %1036  ;;  %v118_v57 = vmul.f32 %v1035_v55, %v1245_v16 }
  0xd0   :  { %v119_v58 = vmul.f32 %v1037_v56, %v1247_v17 }
  0xd1   :  { %973 = vmatmul.mubr.msk.f32.gmra.mxu0 %vm71_vm0, %v1287_v54 }
  0xd2   :  { %975 = vmatprep.mubr.msk.f32.mxu0 %vm71_vm0, %v118_v57  ;;  %1008 = vmatpush3.msra.mxu0 %v119_v58 }
  0xd3   :  { %1009 = vmatprep.subr.mxu0 %v1177_v26 }
  0xd4   :  { %1010 = vmatpush3.msra.mxu0 %v118_v57 }
  0xd5   :  { %976 = vmatmul.mubr.msk.f32.gmra.mxu0 %vm71_vm0, %v119_v58 }
  0xd6   :  { %1011 = vmatprep.mubr.msk.f32.mxu0 %vm1178_vm2, %v1177_v26 }
 0x189   :  { %v968_v60 = vpop.f32.mrf.mxu0 }
 0x18a   :  { %v227_v61 = vadd.f32 %v968_v60, %v924_v59 }
 0x18b   :  { %v221_v62 = vpop.f32.mrf.mxu0 }
 0x18c   :  { %v222_v63 = vadd.f32 %v924_v59, %v221_v62  ;;  %v264_v0 = vsel %vm260_vm1, %v227_v61, -inf }
 0x18d   :  { %265 = vmax.xlane.f32.xlu1 %v264_v0  ;;  %v971_v1 = vpop.f32.mrf.mxu0 }
 0x18e   :  { %v237_v2 = vadd.f32 %v971_v1, %v924_v59  ;;  %v261_v3 = vsel %vm260_vm1, %v222_v63, -inf }
 0x18f   :  { %v231_v4 = vpop.f32.mrf.mxu0  ;;  %262 = vmax.xlane.f32.xlu0 %v261_v3 }
 0x190   :  { %v232_v5 = vadd.f32 %v924_v59, %v231_v4  ;;  %v270_v6 = vsel %vm260_vm1, %v237_v2, -inf }
 0x191   :  { %271 = vmax.xlane.f32.xlu1 %v270_v6  ;;  %v974_v7 = vpop.f32.mrf.mxu0 }
 0x192   :  { %v247_v8 = vadd.f32 %v974_v7, %v924_v59  ;;  %v267_v9 = vsel %vm260_vm1, %v232_v5, -inf }
 0x193   :  { %268 = vmax.xlane.f32.xlu0 %v267_v9  ;;  %v241_v10 = vpop.f32.mrf.mxu0 }
 0x194   :  { %v242_v11 = vadd.f32 %v924_v59, %v241_v10  ;;  %v276_v12 = vsel %vm260_vm1, %v247_v8, -inf }
 0x195   :  { %277 = vmax.xlane.f32.xlu1 %v276_v12  ;;  %v977_v13 = vpop.f32.mrf.mxu0 }
 0x196   :  { %v257_v14 = vadd.f32 %v977_v13, %v924_v59  ;;  %v273_v15 = vsel %vm260_vm1, %v242_v11, -inf }
 0x197   :  { %274 = vmax.xlane.f32.xlu0 %v273_v15  ;;  %v251_v16 = vpop.f32.mrf.mxu0 }
 0x198   :  { %v252_v17 = vadd.f32 %v924_v59, %v251_v16  ;;  %v282_v18 = vsel %vm260_vm1, %v257_v14, -inf }
 0x199   :  { %283 = vmax.xlane.f32.xlu1 %v282_v18 }
 0x19a   :  { %v279_v19 = vsel %vm260_vm1, %v252_v17, -inf }
 0x19b   :  { %280 = vmax.xlane.f32.xlu0 %v279_v19 }
 0x216   :  { %v266_v20 = vpop.xlane.xlu1 %265 }
 0x217   :  { %v286_v21 = vsub.f32 %v227_v61, %v266_v20  ;;  %v385_v20 = vlaneseq }
 0x218   :  { %v263_v22 = vpop.xlane.xlu0 %262 }
 0x219   :  { %v295_v23 = vmul.f32 1.442695, %v286_v21  ;;  %v285_v24 = vsub.f32 %v222_v63, %v263_v22 }
 0x21a   :  { %v272_v27 = vpop.xlane.xlu1 %271 }
 0x21b   :  { %1038 = vpow2.f32 %v295_v23  ;;  %v293_v28 = vmul.f32 1.442695, %v285_v24  ;;  %v288_v29 = vsub.f32 %v237_v2, %v272_v27 }
 0x21c   :  { %v269_v30 = vpop.xlane.xlu0 %268 }
 0x21d   :  { %1040 = vpow2.f32 %v293_v28  ;;  %v299_v31 = vmul.f32 1.442695, %v288_v29  ;;  %v287_v32 = vsub.f32 %v232_v5, %v269_v30 }
 0x21e   :  { %v278_v33 = vpop.xlane.xlu1 %277 }
 0x21f   :  { %1042 = vpow2.f32 %v299_v31  ;;  %v297_v34 = vmul.f32 1.442695, %v287_v32  ;;  %v290_v35 = vsub.f32 %v247_v8, %v278_v33  ;;  %v386_v32 = vshrl.u32 %v385_v20, 7 }
 0x220   :  { %v275_v36 = vpop.xlane.xlu0 %274  ;;  %v388_v33 = vand.u32 127, %v385_v20 }
 0x221   :  { %1044 = vpow2.f32 %v297_v34  ;;  %v303_v37 = vmul.f32 1.442695, %v290_v35  ;;  %v289_v38 = vsub.f32 %v242_v11, %v275_v36 }
 0x222   :  { %v284_v39 = vpop.xlane.xlu1 %283  ;;  %vm389_vm3 = vcmp.eq.s32.totalorder %v386_v32, %v388_v33 }
 0x223   :  { %1046 = vpow2.f32 %v303_v37  ;;  %v301_v40 = vmul.f32 1.442695, %v289_v38  ;;  %v292_v41 = vsub.f32 %v257_v14, %v284_v39 }
 0x224   :  { %v281_v42 = vpop.xlane.xlu0 %280 }
 0x225   :  { %1048 = vpow2.f32 %v301_v40  ;;  %v307_v43 = vmul.f32 1.442695, %v292_v41  ;;  %v291_v44 = vsub.f32 %v252_v17, %v281_v42 }
 0x227   :  { %1050 = vpow2.f32 %v307_v43  ;;  %v305_v45 = vmul.f32 1.442695, %v291_v44 }
 0x228   :  { %v1039_v46 = vpop.eup %1038 }
 0x229   :  { %1052 = vpow2.f32 %v305_v45  ;;  %v312_v48 = vsel %vm260_vm1, %v1039_v46, 0.0 }
 0x22a   :  { %v1041_v49 = vpop.eup %1040  ;;  %313 = vadd.xlane.f32.xlu1 %v312_v48 }
 0x22b   :  { %v309_v51 = vsel %vm260_vm1, %v1041_v49, 0.0 }
 0x22c   :  { %v1043_v52 = vpop.eup %1042  ;;  %310 = vadd.xlane.f32.xlu0 %v309_v51  ;;  %v934_v51 = vsel %vm389_vm3, 1.0, %v1177_v26 }
 0x22d   :  { %v318_v55 = vsel %vm260_vm1, %v1043_v52, 0.0 }
 0x22e   :  { %v1045_v56 = vpop.eup %1044  ;;  %319 = vadd.xlane.f32.xlu1 %v318_v55 }
 0x22f   :  { %v315_v57 = vsel %vm260_vm1, %v1045_v56, 0.0 }
 0x230   :  { %v1047_v58 = vpop.eup %1046  ;;  %316 = vadd.xlane.f32.xlu0 %v315_v57 }
 0x231   :  { %v324_v59 = vsel %vm260_vm1, %v1047_v58, 0.0 }
 0x232   :  { %v1049_v60 = vpop.eup %1048  ;;  %325 = vadd.xlane.f32.xlu1 %v324_v59 }
 0x233   :  { %v321_v61 = vsel %vm260_vm1, %v1049_v60, 0.0 }
 0x234   :  { %v1051_v62 = vpop.eup %1050  ;;  %322 = vadd.xlane.f32.xlu0 %v321_v61 }
 0x235   :  { %v330_v63 = vsel %vm260_vm1, %v1051_v62, 0.0 }
 0x236   :  { %v1053_v0 = vpop.eup %1052  ;;  %331 = vadd.xlane.f32.xlu1 %v330_v63 }
 0x237   :  { %v327_v1 = vsel %vm260_vm1, %v1053_v0, 0.0 }
 0x238   :  { %328 = vadd.xlane.f32.xlu0 %v327_v1 }
 0x2b3   :  { %v314_v2 = vpop.xlane.xlu1 %313 }
 0x2b4   :  { %1054 = vrcp.f32 %v314_v2 }
 0x2b5   :  { %v311_v3 = vpop.xlane.xlu0 %310 }
 0x2b6   :  { %1056 = vrcp.f32 %v311_v3 }
 0x2b7   :  { %v320_v4 = vpop.xlane.xlu1 %319 }
 0x2b8   :  { %1058 = vrcp.f32 %v320_v4 }
 0x2b9   :  { %v317_v5 = vpop.xlane.xlu0 %316 }
 0x2ba   :  { %1060 = vrcp.f32 %v317_v5 }
 0x2bb   :  { %v326_v6 = vpop.xlane.xlu1 %325 }
 0x2bc   :  { %1062 = vrcp.f32 %v326_v6 }
 0x2bd   :  { %v323_v7 = vpop.xlane.xlu0 %322 }
 0x2be   :  { %1064 = vrcp.f32 %v323_v7 }
 0x2bf   :  { %v332_v8 = vpop.xlane.xlu1 %331 }
 0x2c0   :  { %1066 = vrcp.f32 %v332_v8 }
 0x2c1   :  { %v1055_v9 = vpop.eup %1054  ;;  %v329_v10 = vpop.xlane.xlu0 %328 }
 0x2c2   :  { %1068 = vrcp.f32 %v329_v10  ;;  %v342_v11 = vmul.f32 %v1055_v9, %v1039_v46 }
 0x2c3   :  { %v1057_v12 = vpop.eup %1056 }
 0x2c4   :  { %v341_v13 = vmul.f32 %v1057_v12, %v1041_v49  ;;  %v350_v16 = vsel %vm260_vm1, %v342_v11, 0.0 }
 0x2c5   :  { %v1059_v14 = vpop.eup %1058 }
 0x2c6   :  { %401 = vxpose.xlu0.b32.start [1/3] (short) (narrow) %v341_v13, 8  ;;  %v349_v15 = vsel %vm260_vm1, %v341_v13, 0.0  ;;  %v344_v17 = vmul.f32 %v1059_v14, %v1043_v52 }
 0x2c7   :  { %v1061_v18 = vpop.eup %1060  ;;  %v351_v19 = vadd.f32 %v350_v16, %v349_v15 }
 0x2c8   :  { %v343_v21 = vmul.f32 %v1061_v18, %v1045_v56  ;;  %v359_v27 = vsel %vm260_vm1, %v344_v17, 0.0 }
 0x2c9   :  { %v1063_v22 = vpop.eup %1062  ;;  %v352_v23 = vrot.slane %v351_v19, 4 }
 0x2ca   :  { %402 = vxpose.xlu0.b32.cont [2/3] (short) (narrow) %v342_v11, 8  ;;  %507 = vxpose.xlu1.b32.start [1/3] (short) (narrow) %v343_v21, 8  ;;  %v358_v24 = vsel %vm260_vm1, %v343_v21, 0.0  ;;  %v346_v28 = vmul.f32 %v1063_v22, %v1047_v58 }
 0x2cb   :  { %v1065_v29 = vpop.eup %1064  ;;  %v353_v30 = vadd.f32 %v352_v23, %v351_v19  ;;  %v360_v31 = vadd.f32 %v359_v27, %v358_v24 }
 0x2cc   :  { %v345_v34 = vmul.f32 %v1065_v29, %v1049_v60  ;;  %v368_v39 = vsel %vm260_vm1, %v346_v28, 0.0 }
 0x2cd   :  { %v1067_v35 = vpop.eup %1066  ;;  %v361_v36 = vrot.slane %v360_v31, 4  ;;  %v354_v37 = vrot.slane %v353_v30, 2 }
 0x2ce   :  { %508 = vxpose.xlu1.b32.cont [2/3] (short) (narrow) %v344_v17, 8  ;;  %v367_v38 = vsel %vm260_vm1, %v345_v34, 0.0  ;;  %v348_v40 = vmul.f32 %v1067_v35, %v1051_v62 }
 0x2cf   :  { %v1069_v41 = vpop.eup %1068  ;;  %v362_v42 = vadd.f32 %v361_v36, %v360_v31  ;;  %v355_v43 = vadd.f32 %v354_v37, %v353_v30  ;;  %v369_v44 = vadd.f32 %v368_v39, %v367_v38 }
 0x2d0   :  { %v347_v45 = vmul.f32 %v1069_v41, %v1053_v0  ;;  %v377_v55 = vsel %vm260_vm1, %v348_v40, 0.0 }
 0x2d1   :  { %v356_v46 = vrot.slane %v355_v43, 1  ;;  %v363_v48 = vrot.slane %v362_v42, 2  ;;  %v370_v49 = vrot.slane %v369_v44, 4 }
 0x2d2   :  { %v376_v52 = vsel %vm260_vm1, %v347_v45, 0.0 }
 0x2d3   :  { %v357_v56 = vadd.f32 %v356_v46, %v355_v43  ;;  %v364_v57 = vadd.f32 %v363_v48, %v362_v42  ;;  %v371_v58 = vadd.f32 %v370_v49, %v369_v44  ;;  %v378_v59 = vadd.f32 %v377_v55, %v376_v52 }
 0x2d5   :  { %v392_v60 = vmul.f32 %v934_v51, %v357_v56  ;;  %v365_v61 = vrot.slane %v364_v57, 1  ;;  %v372_v62 = vrot.slane %v371_v58, 2  ;;  %v379_v63 = vrot.slane %v378_v59, 4 }
 0x2d7   :  { %v396_v1 = vsub.f32 0.0, %v392_v60  ;;  %v366_v2 = vadd.f32 %v365_v61, %v364_v57  ;;  %v373_v0 = vadd.f32 %v372_v62, %v371_v58  ;;  %v380_v3 = vadd.f32 %v379_v63, %v378_v59 }
 0x2d9   :  { %403 = vxpose.xlu0.b32.end [3/3] (short) (narrow) %v396_v1, 8  ;;  %v393_v4 = vmul.f32 %v934_v51, %v366_v2  ;;  %v374_v5 = vrot.slane %v373_v0, 1  ;;  %v381_v6 = vrot.slane %v380_v3, 2 }
 0x2db   :  { %v397_v7 = vsub.f32 0.0, %v393_v4  ;;  %v375_v8 = vadd.f32 %v374_v5, %v373_v0  ;;  %v382_v9 = vadd.f32 %v381_v6, %v380_v3 }
 0x2dd   :  { %509 = vxpose.xlu1.b32.end [3/3] (short) (narrow) %v397_v7, 8  ;;  %612 = vxpose.xlu0.b32.start [1/3] (short) (narrow) %v345_v34, 8  ;;  %v383_v10 = vrot.slane %v382_v9, 1  ;;  %v394_v11 = vmul.f32 %v934_v51, %v375_v8 }
 0x2df   :  { %v384_v12 = vadd.f32 %v383_v10, %v382_v9  ;;  %v398_v13 = vsub.f32 0.0, %v394_v11 }
 0x2e1   :  { %613 = vxpose.xlu0.b32.cont [2/3] (short) (narrow) %v346_v28, 8  ;;  %717 = vxpose.xlu1.b32.start [1/3] (short) (narrow) %v347_v45, 8  ;;  %v395_v14 = vmul.f32 %v934_v51, %v384_v12 }
 0x2e3   :  { %v399_v15 = vsub.f32 0.0, %v395_v14 }
 0x2e5   :  { %614 = vxpose.xlu0.b32.end [3/3] (short) (narrow) %v398_v13, 8  ;;  %718 = vxpose.xlu1.b32.cont [2/3] (short) (narrow) %v348_v40, 8 }
 0x2e9   :  { %719 = vxpose.xlu1.b32.end [3/3] (short) (narrow) %v399_v15, 8 }
 0x34d   :  { %v417_v16 = vpop.trf.xlu0 }
 0x34e   :  { %985 = vmatmul.mubr.msk.f32.vlgmr.msra.gmra.mxu1 %vm433_vm4, %v417_v16 }
 0x34f   :  { %988 = vmatpush3.msra.mxu1 %v1259_v25  ;;  %993 = vmatprep.mubr.msk.f32.mxu1 %vm1178_vm2, %v1177_v26 }
 0x350   :  { %989 = vmatprep.subr.mxu1 %v1177_v26 }
 0x351   :  { %990 = vmatpush3.msra.mxu1 %v1273_v50  ;;  %v523_v17 = vpop.trf.xlu1 }
 0x352   :  { %991 = vmatprep.subr.mxu1 %v1177_v26 }
 0x353   :  { %992 = vmatpush3.msra.mxu1 %v1268_v47 }
 0x354   :  { %994 = vmatmul.mubr.msk.f32.vlgmr.msra.gmra.mxu1 %vm433_vm4, %v523_v17  ;;  %996 = vmatprep.subr.mxu1 %v1177_v26 }
 0x355   :  { %997 = vmatpush3.msra.mxu1 %v1259_v25  ;;  %1002 = vmatprep.mubr.msk.f32.mxu1 %vm1178_vm2, %v1177_v26 }
 0x356   :  { %998 = vmatprep.subr.mxu1 %v1177_v26 }
 0x357   :  { %999 = vmatpush3.msra.mxu1 %v1287_v54 }
 0x358   :  { %1000 = vmatprep.subr.mxu1 %v1177_v26 }
 0x359   :  { %1001 = vmatpush3.msra.mxu1 %v1279_v53  ;;  %v628_v50 = vpop.trf.xlu0 }
 0x35a   :  { %1003 = vmatmul.mubr.msk.f32.vlgmr.msra.gmra.mxu1 %vm433_vm4, %v628_v50 }
 0x35d   :  { %v733_v47 = vpop.trf.xlu1 }
 0x35e   :  { %1012 = vmatmul.mubr.msk.f32.vlgmr.msra.gmra.mxu0 %vm433_vm4, %v733_v47 }
 0x40e   :  { %v503_v18 = vpop.f32.mrf.mxu1 }
 0x40f   :  { %v822_v19 = vmul.f32 %v503_v18, %v503_v18 }
 0x410   :  { %v986_v25 = vpop.f32.mrf.mxu1 }
 0x411   :  { %v826_v20 = vsel %vm71_vm0, %v822_v19, 0.0 }
 0x412   :  { %827 = vadd.xlane.f32.xlu0 %v826_v20 }
 0x414   :  { %v608_v21 = vpop.f32.mrf.mxu1 }
 0x415   :  { %v823_v22 = vmul.f32 %v608_v21, %v608_v21 }
 0x416   :  { %v995_v23 = vpop.f32.mrf.mxu1 }
 0x417   :  { %v829_v54 = vsel %vm71_vm0, %v823_v22, 0.0 }
 0x418   :  { %830 = vadd.xlane.f32.xlu1 %v829_v54 }
 0x41a   :  { %v713_v26 = vpop.f32.mrf.mxu1 }
 0x41b   :  { %v824_v53 = vmul.f32 %v713_v26, %v713_v26 }
 0x41c   :  { %v1004_v24 = vpop.f32.mrf.mxu1 }
 0x41d   :  { %v832_v27 = vsel %vm71_vm0, %v824_v53, 0.0 }
 0x41e   :  { %v818_v28 = vpop.f32.mrf.mxu0  ;;  %833 = vadd.xlane.f32.xlu0 %v832_v27 }
 0x41f   :  { %v825_v29 = vmul.f32 %v818_v28, %v818_v28 }
 0x420   :  { %v1013_v30 = vpop.f32.mrf.mxu0 }
 0x421   :  { %v835_v31 = vsel %vm71_vm0, %v825_v29, 0.0 }
 0x422   :  { %836 = vadd.xlane.f32.xlu1 %v835_v31 }
 0x49b   :  { %v828_v32 = vpop.xlane.xlu0 %827 }
 0x49c   :  { %v838_v33 = vmax.f32 %v828_v32, 1e-24 }
 0x49e   :  { %1070 = vrsqrt.f32 %v838_v33 }
 0x4a1   :  { %v831_v34 = vpop.xlane.xlu1 %830 }
 0x4a2   :  { %v839_v35 = vmax.f32 %v831_v34, 1e-24 }
 0x4a4   :  { %1072 = vrsqrt.f32 %v839_v35 }
 0x4a7   :  { %v834_v36 = vpop.xlane.xlu0 %833 }
 0x4a8   :  { %v840_v37 = vmax.f32 %v834_v36, 1e-24 }
 0x4aa   :  { %1074 = vrsqrt.f32 %v840_v37 }
 0x4ab   :  { %v1071_v38 = vpop.eup %1070  ;;  %v837_v39 = vpop.xlane.xlu1 %836 }
 0x4ac   :  { %v841_v40 = vmax.f32 %v837_v39, 1e-24  ;;  %v846_v41 = vmul.f32 %v1071_v38, %v503_v18 }
 0x4ae   :  { %1076 = vrsqrt.f32 %v841_v40  ;;  %v850_v42 = vmul.f32 %v846_v41, %v846_v41 }
 0x4b0   :  { %v854_v43 = vsel %vm71_vm0, %v850_v42, 0.0 }
 0x4b1   :  { %v1073_v44 = vpop.eup %1072  ;;  %855 = vadd.xlane.f32.xlu0 %v854_v43 }
 0x4b2   :  { %v847_v45 = vmul.f32 %v1073_v44, %v608_v21 }
 0x4b4   :  { %v851_v46 = vmul.f32 %v847_v45, %v847_v45 }
 0x4b6   :  { %v857_v48 = vsel %vm71_vm0, %v851_v46, 0.0 }
 0x4b7   :  { %v1075_v49 = vpop.eup %1074  ;;  %858 = vadd.xlane.f32.xlu1 %v857_v48 }
 0x4b8   :  { %v848_v51 = vmul.f32 %v1075_v49, %v713_v26 }
 0x4ba   :  { %v852_v52 = vmul.f32 %v848_v51, %v848_v51 }
 0x4bb   :  { %v1077_v55 = vpop.eup %1076 }
 0x4bc   :  { %v860_v56 = vsel %vm71_vm0, %v852_v52, 0.0  ;;  %v849_v57 = vmul.f32 %v1077_v55, %v818_v28 }
 0x4bd   :  { %861 = vadd.xlane.f32.xlu0 %v860_v56 }
 0x4be   :  { %v853_v58 = vmul.f32 %v849_v57, %v849_v57 }
 0x4c0   :  { %v863_v59 = vsel %vm71_vm0, %v853_v58, 0.0 }
 0x4c1   :  { %864 = vadd.xlane.f32.xlu1 %v863_v59 }
 0x53a   :  { %v856_v60 = vpop.xlane.xlu0 %855 }
 0x53b   :  { %v866_v61 = vrot.slane %v856_v60, 4 }
 0x53d   :  { %v867_v62 = vadd.f32 %v866_v61, %v856_v60 }
 0x53f   :  { %v868_v63 = vrot.slane %v867_v62, 2 }
 0x540   :  { %v859_v1 = vpop.xlane.xlu1 %858 }
 0x541   :  { %v869_v2 = vadd.f32 %v868_v63, %v867_v62  ;;  %v872_v0 = vrot.slane %v859_v1, 4 }
 0x543   :  { %v870_v3 = vrot.slane %v869_v2, 1  ;;  %v873_v4 = vadd.f32 %v872_v0, %v859_v1 }
 0x545   :  { %v871_v5 = vadd.f32 %v870_v3, %v869_v2  ;;  %v874_v6 = vrot.slane %v873_v4, 2 }
 0x546   :  { %v862_v7 = vpop.xlane.xlu0 %861 }
 0x547   :  { %v890_v8 = vmax.f32 %v871_v5, 1e-24  ;;  %v875_v9 = vadd.f32 %v874_v6, %v873_v4  ;;  %v878_v10 = vrot.slane %v862_v7, 4 }
 0x549   :  { %1078 = vrsqrt.f32 %v890_v8  ;;  %v876_v11 = vrot.slane %v875_v9, 1  ;;  %v879_v12 = vadd.f32 %v878_v10, %v862_v7 }
 0x54a   :  { %v865_v13 = vpop.xlane.xlu1 %864 }
 0x54b   :  { %v877_v14 = vadd.f32 %v876_v11, %v875_v9  ;;  %v880_v15 = vrot.slane %v879_v12, 2  ;;  %v884_v16 = vrot.slane %v865_v13, 4 }
 0x54d   :  { %v891_v17 = vmax.f32 %v877_v14, 1e-24  ;;  %v881_v50 = vadd.f32 %v880_v15, %v879_v12  ;;  %v885_v47 = vadd.f32 %v884_v16, %v865_v13 }
 0x54f   :  { %1080 = vrsqrt.f32 %v891_v17  ;;  %v882_v18 = vrot.slane %v881_v50, 1  ;;  %v886_v19 = vrot.slane %v885_v47, 2 }
 0x551   :  { %v883_v25 = vadd.f32 %v882_v18, %v881_v50  ;;  %v887_v20 = vadd.f32 %v886_v19, %v885_v47 }
 0x553   :  { %v892_v21 = vmax.f32 %v883_v25, 1e-24  ;;  %v888_v22 = vrot.slane %v887_v20, 1 }
 0x555   :  { %1082 = vrsqrt.f32 %v892_v21  ;;  %v889_v23 = vadd.f32 %v888_v22, %v887_v20 }
 0x556   :  { %v1079_v54 = vpop.eup %1078 }
 0x557   :  { %v893_v26 = vmax.f32 %v889_v23, 1e-24  ;;  %v898_v53 = vmul.f32 %v1079_v54, %v846_v41 }
 0x559   :  { %1084 = vrsqrt.f32 %v893_v26  ;;  %902 = vst.msk [vmem:[#allocation8] sm:$0xff] %vm71_vm0, %v898_v53 }
 0x55c   :  { %v1081_v24 = vpop.eup %1080 }
 0x55d   :  { %v899_v27 = vmul.f32 %v1081_v24, %v847_v45 }
 0x55f   :  { %903 = vst.msk [vmem:[#allocation8 + $0x8] sm:$0xff] %vm71_vm0, %v899_v27 }
 0x562   :  { %v1083_v28 = vpop.eup %1082 }
 0x563   :  { %v900_v29 = vmul.f32 %v1083_v28, %v848_v51 }
 0x565   :  { %904 = vst.msk [vmem:[#allocation8 + $0x10] sm:$0xff] %vm71_vm0, %v900_v29 }
 0x566   :  { %v1085_v30 = vpop.eup %1084 }
 0x567   :  { %v901_v31 = vmul.f32 %v1085_v30, %v849_v57 }
 0x569   :  { %905 = vst.msk [vmem:[#allocation8 + $0x18] sm:$0xff] %vm71_vm0, %v901_v31 }
 0x56a   :  { %1157 = shalt.err (!%p1154_p5)
}
 0x56b   :  { %917 = dma.vmem_to_hbm [thread:$0]  %s912_s5, 512, %s1371_s4, [#allocation4], %s1174_s23, %s1174_s23, %s1175_s24  }
 0x56c   :  { %1170 = dma.done.wait [#allocation4], 512  }
 0x56d   :  { %1171 = vsyncadd [#allocation4], 4294966784 }
 0x56e   :  { %921 = vsyncpa [#allocation3], 1 }
 0x56f   :  { %922 = vsyncpa [#allocation6], 1 }
 0x570   :  { %923 = vsyncpa [#allocation4], 1 }

</bundles_post_ra>
